<compile_context>
chip_gen: v6e
topology: v6e:2x2x1
jax: 0.10.0
libtpu: 0.0.40
codegen_flags: <defaults>
</compile_context>

<pallas_src>
import jax
import jax.numpy as jnp
from jax import lax
from jax.experimental import pallas as pl
from jax.experimental.pallas import tpu as pltpu


_SUBLANE = 8
_LANE = 128
_MiB = 1024 * 1024


# ---------------------------------------------------------------------------
# Kernels
# ---------------------------------------------------------------------------

def _linear_single_block_kernel(x_ref, w_ref, b_ref, o_ref):
    # x_ref: (M, K), w_ref: (N, K), b_ref: (1, N), o_ref: (M, N)
    acc = lax.dot_general(
        x_ref[...], w_ref[...],
        dimension_numbers=(((1,), (1,)), ((), ())),   # contract K with K
        preferred_element_type=jnp.float32)
    o_ref[...] = (acc + b_ref[...].astype(jnp.float32)).astype(o_ref.dtype)


def _linear_tiled_f32_kernel(x_ref, w_ref, b_ref, o_ref):
    # f32 output: accumulate directly into the output block (it is resident
    # in VMEM across the 'arbitrary' k axis).  Initialize with the bias at
    # k==0 so there is no separate add/copy epilogue.
    k = pl.program_id(2)

    @pl.when(k == 0)
    def _():
        o_ref[...] = jnp.broadcast_to(
            b_ref[...].astype(o_ref.dtype), o_ref.shape)

    o_ref[...] += lax.dot_general(
        x_ref[...], w_ref[...],
        dimension_numbers=(((1,), (1,)), ((), ())),   # contract K with K
        preferred_element_type=jnp.float32)


def _linear_tiled_acc_kernel(x_ref, w_ref, b_ref, o_ref, acc_ref):
    # Generic output dtype: f32 scratch accumulator, single cast at the end.
    k = pl.program_id(2)

    @pl.when(k == 0)
    def _():
        acc_ref[...] = jnp.broadcast_to(
            b_ref[...].astype(jnp.float32), acc_ref.shape)

    acc_ref[...] += lax.dot_general(
        x_ref[...], w_ref[...],
        dimension_numbers=(((1,), (1,)), ((), ())),
        preferred_element_type=jnp.float32)

    @pl.when(k == pl.num_programs(2) - 1)
    def _():
        o_ref[...] = acc_ref[...].astype(o_ref.dtype)


# ---------------------------------------------------------------------------
# Tile selection helpers
# ---------------------------------------------------------------------------

def _round_up(a, b):
    return -(-a // b) * b


def _vmem_budget_bytes():
    """Scoped VMEM budget to request via vmem_limit_bytes."""
    phys = None
    try:
        info = pltpu.get_tpu_info()
        phys = getattr(info, "vmem_capacity_bytes", None)
    except Exception:
        phys = None
    if not phys:
        phys = 64 * _MiB            # conservative (v7x per-TC physical)
    # Half of physical, clamped to [32, 64] MiB -> 64 MiB on v5e/v6e (128 MiB
    # physical), 32 MiB on v7x (64 MiB physical).
    return int(min(max(phys // 2, 32 * _MiB), 64 * _MiB))


def _is_multi_tc_device():
    """True on parts that expose >1 TensorCore per device (v7x)."""
    try:
        kind = jax.devices()[0].device_kind.lower()
    except Exception:
        return False
    return "v7" in kind


_TILE_CANDIDATES = (
    (512, 1024, 1024),
    (512, 512, 1024),
    (512, 512, 512),
    (256, 512, 512),
    (256, 256, 512),
    (256, 256, 256),
    (128, 256, 256),
    (128, 128, 256),
    (128, 128, 128),
)


def _footprint_bytes(tm, tn, tk, in_isz, out_isz, use_scratch):
    fp = 2 * (tm * tk + tn * tk) * in_isz     # double-buffered x / W tiles
    fp += 2 * tm * tn * out_isz               # double-buffered output tile
    fp += 2 * tn * 4                          # bias tile (negligible)
    if use_scratch:
        fp += tm * tn * 4                     # f32 accumulator scratch
    return fp


def _select_tiles(M, N, K, in_isz, out_isz, use_scratch, budget,
                  split_parallel):
    cap = int(0.6 * budget)
    chosen = None
    for tm, tn, tk in _TILE_CANDIDATES:
        # Clamp tiles to the (8,128)-rounded problem so we never over-pad.
        tm = max(_SUBLANE, min(tm, _round_up(M, _SUBLANE)))
        tn = max(_LANE, min(tn, _round_up(N, _LANE)))
        tk = max(_LANE, min(tk, _round_up(K, _LANE)))
        if _footprint_bytes(tm, tn, tk, in_isz, out_isz, use_scratch) <= cap:
            chosen = (tm, tn, tk)
            break
    if chosen is None:
        chosen = (max(_SUBLANE, min(128, _round_up(M, _SUBLANE))), _LANE, _LANE)
    tm, tn, tk = chosen

    if split_parallel and pl.cdiv(M, tm) * pl.cdiv(N, tn) < 2:
        # v7x: 2 TensorCores are sharded across the 'parallel' grid axes; make
        # sure at least two parallel blocks exist when the problem allows it.
        if _round_up(N, _LANE) >= 2 * _LANE:
            tn = _round_up(pl.cdiv(N, 2), _LANE)
        elif _round_up(M, _SUBLANE) >= 2 * _SUBLANE:
            tm = _round_up(pl.cdiv(M, 2), _SUBLANE)
    return tm, tn, tk


# ---------------------------------------------------------------------------
# Wrapper
# ---------------------------------------------------------------------------

def lazy_ridge_forward(x, weight, bias, *, tiles=None, use_bf16_matmul=False):
    """Equivalent of LazyRidge.forward: x @ weight.T + bias.

    x:      (M, K)  input
    weight: (N, K)  (PyTorch nn.Linear convention: out_features x in_features)
    bias:   (N,)
    returns (M, N)  in x.dtype
    """
    M, K = x.shape
    N, Kw = weight.shape
    assert K == Kw, "in_features mismatch"
    out_dtype = x.dtype
    out_isz = jnp.dtype(out_dtype).itemsize

    # Optional bf16 MXU inputs (f32 accumulation stays via
    # preferred_element_type); also halves input DMA bytes.
    in_dtype = jnp.bfloat16 if use_bf16_matmul else x.dtype
    x_in = x.astype(in_dtype) if x.dtype != in_dtype else x
    w_in = weight.astype(in_dtype) if weight.dtype != in_dtype else weight
    in_isz = jnp.dtype(in_dtype).itemsize
    b2d = bias.reshape(1, N)

    budget = _vmem_budget_bytes()

    # ---- Fast path: whole problem fits in one block ---------------------
    single_fp = (M * K + N * K) * in_isz + M * N * out_isz + 2 * N * 4
    if (tiles is None and M <= 512 and N <= 512 and K <= 2048
            and single_fp <= int(0.4 * budget)):
        cost = pl.CostEstimate(
            flops=2 * M * N * K, transcendentals=0,
            bytes_accessed=(M * K + N * K) * in_isz + (M * N + N) * out_isz)
        return pl.pallas_call(
            _linear_single_block_kernel,
            out_shape=jax.ShapeDtypeStruct((M, N), out_dtype),
            grid_spec=pltpu.PrefetchScalarGridSpec(
                num_scalar_prefetch=0,
                grid=(1,),
                in_specs=[
                    pl.BlockSpec((M, K), lambda i: (0, 0)),   # x (full)
                    pl.BlockSpec((N, K), lambda i: (0, 0)),   # W (full, native)
                    pl.BlockSpec((1, N), lambda i: (0, 0)),   # bias
                ],
                out_specs=pl.BlockSpec((M, N), lambda i: (0, 0)),
            ),
            compiler_params=pltpu.CompilerParams(
                dimension_semantics=("arbitrary",)),
            cost_estimate=cost,
        )(x_in, w_in, b2d)

    # ---- General path: 3-D (M, N, K) grid, K innermost reduction --------
    use_scratch = jnp.dtype(out_dtype) != jnp.dtype(jnp.float32)
    if tiles is None:
        tm, tn, tk = _select_tiles(M, N, K, in_isz, out_isz, use_scratch,
                                   budget, _is_multi_tc_device())
    else:
        tm, tn, tk = tiles
    assert tm % _SUBLANE == 0 and tn % _LANE == 0 and tk % _LANE == 0, (
        "tiles must satisfy the TPU (8, 128) layout constraint")

    Mp, Np, Kp = _round_up(M, tm), _round_up(N, tn), _round_up(K, tk)
    # Pad only when needed (zero K-padding contributes nothing to the matmul).
    xp = x_in if (Mp == M and Kp == K) else jnp.pad(
        x_in, ((0, Mp - M), (0, Kp - K)))
    wp = w_in if (Np == N and Kp == K) else jnp.pad(
        w_in, ((0, Np - N), (0, Kp - K)))
    bp = b2d if Np == N else jnp.pad(b2d, ((0, 0), (0, Np - N)))

    grid = (Mp // tm, Np // tn, Kp // tk)
    cost = pl.CostEstimate(
        flops=2 * M * N * K,
        transcendentals=0,
        # Include tile-reload factors: x is re-read once per N-tile, W once
        # per M-tile; output (and bias) written/read once.
        bytes_accessed=((M * K) * (Np // tn) + (N * K) * (Mp // tm)) * in_isz
                       + (M * N + N) * out_isz,
    )

    kernel = _linear_tiled_acc_kernel if use_scratch else _linear_tiled_f32_kernel
    scratch = [pltpu.VMEM((tm, tn), jnp.float32)] if use_scratch else []

    out = pl.pallas_call(
        kernel,
        out_shape=jax.ShapeDtypeStruct((Mp, Np), out_dtype),
        grid_spec=pltpu.PrefetchScalarGridSpec(
            num_scalar_prefetch=0,
            grid=grid,
            in_specs=[
                pl.BlockSpec((tm, tk), lambda i, j, k: (i, k)),   # x tile
                pl.BlockSpec((tn, tk), lambda i, j, k: (j, k)),   # W tile (N,K)
                pl.BlockSpec((1, tn), lambda i, j, k: (0, j)),    # bias tile
            ],
            out_specs=pl.BlockSpec((tm, tn), lambda i, j, k: (i, j)),
            scratch_shapes=scratch,
        ),
        compiler_params=pltpu.CompilerParams(
            dimension_semantics=("parallel", "parallel", "arbitrary"),
            vmem_limit_bytes=budget,
        ),
        cost_estimate=cost,
    )(xp, wp, bp)
    return out[:M, :N] if (Mp != M or Np != N) else out


# ---------------------------------------------------------------------------
# Self-test
# ---------------------------------------------------------------------------

if __name__ == "__main__":
    key = jax.random.PRNGKey(0)

    # --- Test 1: small shapes consistent with the module (fast path) -----
    batch, in_features, out_features = 16, 32, 16
    kx, kw, kb, k2, k3 = jax.random.split(key, 5)

    x = jax.random.normal(kx, (batch, in_features), dtype=jnp.float32)
    bound = 1.0 / jnp.sqrt(jnp.float32(in_features))
    weight = jax.random.uniform(
        kw, (out_features, in_features), dtype=jnp.float32,
        minval=-bound, maxval=bound)
    bias = jax.random.uniform(
        kb, (out_features,), dtype=jnp.float32, minval=-bound, maxval=bound)

    y = jax.block_until_ready(lazy_ridge_forward(x, weight, bias))
    y_ref = x @ weight.T + bias
    assert y.shape == (batch, out_features)
    assert jnp.allclose(y, y_ref, atol=1e-4, rtol=1e-4), "small-path mismatch"

    # --- Test 2: ragged shapes, explicit small tiles (tiled path + pad) --
    M2, K2, N2 = 200, 160, 130
    kx2, kw2, kb2 = jax.random.split(k2, 3)
    x2 = jax.random.normal(kx2, (M2, K2), dtype=jnp.float32)
    w2 = jax.random.normal(kw2, (N2, K2), dtype=jnp.float32) * 0.05
    b2 = jax.random.normal(kb2, (N2,), dtype=jnp.float32) * 0.05

    y2 = jax.block_until_ready(
        lazy_ridge_forward(x2, w2, b2, tiles=(64, 128, 128)))
    y2_ref = x2 @ w2.T + b2
    assert y2.shape == (M2, N2)
    assert jnp.allclose(y2, y2_ref, atol=1e-3, rtol=1e-4), "tiled-path mismatch"

    # --- Test 3: medium shape, auto tile selection (f32 in-place acc) ----
    M3, K3, N3 = 1024, 768, 640
    kx3, kw3, kb3 = jax.random.split(k3, 3)
    x3 = jax.random.normal(kx3, (M3, K3), dtype=jnp.float32)
    w3 = jax.random.normal(kw3, (N3, K3), dtype=jnp.float32) * 0.02
    b3 = jax.random.normal(kb3, (N3,), dtype=jnp.float32) * 0.02

    y3 = jax.block_until_ready(lazy_ridge_forward(x3, w3, b3))
    y3_ref = x3 @ w3.T + b3
    assert y3.shape == (M3, N3)
    assert jnp.allclose(y3, y3_ref, atol=1e-2, rtol=1e-4), "auto-tile mismatch"

    print("KERNEL_OK")
</pallas_src>

<mosaic_0001>
module attributes {stable_mosaic.version = 11 : i64} {
  func.func @_linear_single_block_kernel(%arg0: i32, %arg1: memref<16x32xf32, #tpu.memory_space<vmem>>, %arg2: memref<16x32xf32, #tpu.memory_space<vmem>>, %arg3: memref<1x16xf32, #tpu.memory_space<vmem>>, %arg4: memref<16x16xf32, #tpu.memory_space<vmem>>) attributes {dimension_semantics = [#tpu.dimension_semantics<arbitrary>], iteration_bounds = array<i64: 1>, scalar_prefetch = 0 : i64, scratch_operands = 0 : i64, tpu.core_type = #tpu.core_type<tc>, window_params = [{pipeline_mode = #tpu.pipeline_mode<synchronous>, transform_indices = @transform_0, window_bounds = array<i64: 16, 32>}, {pipeline_mode = #tpu.pipeline_mode<synchronous>, transform_indices = @transform_1, window_bounds = array<i64: 16, 32>}, {pipeline_mode = #tpu.pipeline_mode<synchronous>, transform_indices = @transform_2, window_bounds = array<i64: 1, 16>}, {pipeline_mode = #tpu.pipeline_mode<synchronous>, transform_indices = @transform_3, window_bounds = array<i64: 16, 16>}]} {
    %c0 = arith.constant 0 : index
    %c0_0 = arith.constant 0 : index
    %0 = vector.load %arg1[%c0, %c0_0] : memref<16x32xf32, #tpu.memory_space<vmem>>, vector<16x32xf32>
    %c0_1 = arith.constant 0 : index
    %c0_2 = arith.constant 0 : index
    %1 = vector.load %arg2[%c0_1, %c0_2] : memref<16x32xf32, #tpu.memory_space<vmem>>, vector<16x32xf32>
    %cst = arith.constant dense<0.000000e+00> : vector<16x16xf32>
    %2 = tpu.matmul %0, %1, %cst {dimension_numbers = #tpu.dot_dimension_numbers<[1], [1], [0], [0], [0, 0, 1, 0], [], []>} : vector<16x32xf32>, vector<16x32xf32>, vector<16x16xf32> -> vector<16x16xf32>
    %c0_3 = arith.constant 0 : index
    %c0_4 = arith.constant 0 : index
    %3 = vector.load %arg3[%c0_3, %c0_4] : memref<1x16xf32, #tpu.memory_space<vmem>>, vector<1x16xf32>
    %4 = vector.broadcast %3 : vector<1x16xf32> to vector<16x16xf32>
    %5 = arith.addf %2, %4 : vector<16x16xf32>
    %c0_5 = arith.constant 0 : index
    %c0_6 = arith.constant 0 : index
    %6 = vector.load %arg4[%c0_5, %c0_6] : memref<16x16xf32, #tpu.memory_space<vmem>>, vector<16x16xf32>
    tpu.vector_store %arg4[%c0_5, %c0_6], %5 {strides = array<i32>} : memref<16x16xf32, #tpu.memory_space<vmem>>, vector<16x16xf32>,
    return
  }
  func.func @transform_0(%arg0: i32) -> (i32, i32) {
    %c0_i32 = arith.constant 0 : i32
    %c0_i32_0 = arith.constant 0 : i32
    %c0_i32_1 = arith.constant 0 : i32
    return %c0_i32, %c0_i32_0 : i32, i32
  }
  func.func @transform_1(%arg0: i32) -> (i32, i32) {
    %c0_i32 = arith.constant 0 : i32
    %c0_i32_0 = arith.constant 0 : i32
    %c0_i32_1 = arith.constant 0 : i32
    return %c0_i32, %c0_i32_0 : i32, i32
  }
  func.func @transform_2(%arg0: i32) -> (i32, i32) {
    %c0_i32 = arith.constant 0 : i32
    %c0_i32_0 = arith.constant 0 : i32
    %c0_i32_1 = arith.constant 0 : i32
    return %c0_i32, %c0_i32_0 : i32, i32
  }
  func.func @transform_3(%arg0: i32) -> (i32, i32) {
    %c0_i32 = arith.constant 0 : i32
    %c0_i32_0 = arith.constant 0 : i32
    %c0_i32_1 = arith.constant 0 : i32
    return %c0_i32, %c0_i32_0 : i32, i32
  }
}

</mosaic_0001>

<bundles_post_ra>
// kernel: tpu_custom_call.1
= control target key start
LH: loop header
LB: loop body
LE: loop exit
PB: predicated region body
PF: predicated region fallthrough
CT: control target
= control target key end

     0   :  { %8 = vsyncpa [#allocation3], 0  ;;  %s296_s0 = inlined_call_operand.hbm [shape: f32[16,32], index: 0, kind: input, shape index: {}]   ;;  %s297_s1 = inlined_call_operand.hbm [shape: f32[16,32], index: 1, kind: input, shape index: {}]   ;;  %s298_s2 = inlined_call_operand.vmem [shape: f32[1,16], index: 2, kind: input, shape index: {}]   ;;  %s299_s3 = inlined_call_operand.hbm [shape: f32[16,16], index: 3, kind: output, shape index: {}]  }
   0x1   :  { %9 = vsyncpa [#allocation6], 0 }
   0x2   :  { %10 = vsyncpa [#allocation4], 0  ;;  %s250_s12 = smov [#allocation2]  }
   0x3   :  { %s16_s13 = sshll.u32 %s250_s12, 4  ;;  %s17_s13 = int_to_ptr.vmem [resolvable:$true] %s16_s13 }
   0x4   :  { %s192_s14 = scalar_lea.vmem %s17_s13, 256  ;;  %p197_p1 = scmp.lt.s32.totalorder %s17_s13, %s17_s13 }
   0x5   :  { %p193_p0 = scmp.ne.s32.totalorder %s17_s13, %s192_s14  ;;  %p198_p2 = scmp.lt.s32.totalorder %s192_s14, %s192_s14 }
   0x7   :  { %p199_p3 = por %p198_p2, %p197_p1 }
   0x9   :  { %p200_p4 = pnand %p199_p3, %p193_p0 }
   0xb   :  { %203 = shalt.err (!%p200_p4)
}
   0xc   :  { %s251_s15 = smov 128   ;;  %s252_s16 = smov 8  }
   0xd   :  { %22 = dma.hbm_to_vmem [thread:$0]  %s296_s0, 256, %s17_s13, [#allocation3], %s251_s15, %s251_s15, %s252_s16  }
   0xe   :  { %s253_s19 = smov [#allocation5]  }
   0xf   :  { %s28_s20 = sshll.u32 %s253_s19, 4  ;;  %s29_s20 = int_to_ptr.vmem [resolvable:$true] %s28_s20 }
  0x10   :  { %s212_s21 = scalar_lea.vmem %s29_s20, 256  ;;  %p217_p6 = scmp.lt.s32.totalorder %s29_s20, %s29_s20 }
  0x11   :  { %p213_p5 = scmp.ne.s32.totalorder %s29_s20, %s212_s21  ;;  %p218_p7 = scmp.lt.s32.totalorder %s212_s21, %s212_s21 }
  0x13   :  { %p219_p8 = por %p218_p7, %p217_p6 }
  0x15   :  { %p220_p9 = pnand %p219_p8, %p213_p5 }
  0x17   :  { %223 = shalt.err (!%p220_p9)
}
  0x18   :  { %34 = dma.hbm_to_vmem [thread:$0]  %s297_s1, 256, %s29_s20, [#allocation6], %s251_s15, %s251_s15, %s252_s16  }
  0x19   :  { %244 = dma.done.wait [#allocation3], 256  }
  0x1a   :  { %245 = vsyncadd [#allocation3], 4294967040 }
  0x1b   :  { %246 = dma.done.wait [#allocation6], 256  }
  0x1c   :  { %247 = vsyncadd [#allocation6], 4294967040  ;;  %vm54_vm0 = vcmask 261120   ;;  %v46_v0 = vld [vmem:[#allocation5 + $0x8] sm:$0xff]  ;;  %v45_v1 = vld [vmem:[#allocation5] sm:$0xff]  ;;  %vm142_vm1 = vcmask 130048  }
  0x1d   :  { %v43_v2 = vld [vmem:[#allocation2] sm:$0xff]  ;;  %172 = vmatprep.subr.msk.mxu0 %vm54_vm0, %v46_v0  ;;  %v44_v3 = vld [vmem:[#allocation2 + $0x8] sm:$0xff]  ;;  %s254_s1 = smov [#allocation7]  }
  0x1e   :  { %176 = vmatprep.mubr.msk.f32.mxu0 %vm54_vm0, %v43_v2  ;;  %173 = vmatpush3.xpose.msk.msra.mxu0 %vm54_vm0, %v46_v0  ;;  %v163_v4 = vld [vmem:[%s298_s2] ss:$0 sm:$0xff]  ;;  %s150_s25 = sshll.u32 %s254_s1, 4  ;;  %s151_s25 = int_to_ptr.vmem [resolvable:$true] %s150_s25 }
  0x1f   :  { %174 = vmatprep.subr.msk.mxu0 %vm54_vm0, %v45_v1  ;;  %s224_s26 = scalar_lea.vmem %s151_s25, 256  ;;  %p229_p11 = scmp.lt.s32.totalorder %s151_s25, %s151_s25 }
  0x20   :  { %p225_p10 = scmp.ne.s32.totalorder %s151_s25, %s224_s26  ;;  %p230_p12 = scmp.lt.s32.totalorder %s224_s26, %s224_s26 }
  0x22   :  { %175 = vmatpush3.xpose.msk.msra.mxu0 %vm54_vm0, %v45_v1  ;;  %p231_p13 = por %p230_p12, %p229_p11 }
  0x24   :  { %p232_p0 = pnand %p231_p13, %p225_p10 }
  0x25   :  { %177 = vmatmul.mubr.msk.f32.vlgmr.msra.gmra.mxu0 %vm54_vm0, %v44_v3 }
  0xe5   :  { %v178_v5 = vpop.f32.mrf.mxu0 }
  0xe6   :  { %v139_v6 = vadd.f32 %v178_v5, %v163_v4 }
  0xe7   :  { %v133_v7 = vpop.f32.mrf.mxu0 }
  0xe8   :  { %v134_v8 = vadd.f32 %v163_v4, %v133_v7  ;;  %144 = vst.msk [vmem:[#allocation7 + $0x8] sm:$0xff] %vm142_vm1, %v139_v6 }
  0xea   :  { %143 = vst.msk [vmem:[#allocation7] sm:$0xff] %vm142_vm1, %v134_v8 }
  0xeb   :  { %235 = shalt.err (!%p232_p0)
}
  0xec   :  { %156 = dma.vmem_to_hbm [thread:$0]  %s151_s25, 256, %s299_s3, [#allocation4], %s251_s15, %s251_s15, %s252_s16  }
  0xed   :  { %248 = dma.done.wait [#allocation4], 256  }
  0xee   :  { %249 = vsyncadd [#allocation4], 4294967040 }
  0xef   :  { %160 = vsyncpa [#allocation3], 1 }
  0xf0   :  { %161 = vsyncpa [#allocation6], 1 }
  0xf1   :  { %162 = vsyncpa [#allocation4], 1 }

</bundles_post_ra>
